<compile_context>
chip_gen: v6e
topology: v6e:2x2x1
jax: 0.10.0
libtpu: 0.0.40
codegen_flags: <defaults>
</compile_context>

<pallas_src>
import jax
import jax.numpy as jnp
from jax.experimental import pallas as pl
from jax.experimental.pallas import tpu as pltpu

LN_EPS = 1e-5
LANE = 128


def _round_up(x, m):
    return ((x + m - 1) // m) * m


def _make_actor_kernel(F, hidden):
    """Returns the kernel body; F = padded lane width, hidden = true H."""
    inv_h = 1.0 / float(hidden)

    def kernel(x_ref, w_ref, v_ref, out_ref):
        x = x_ref[...]                       # [TB, F] f32 (padded lanes are 0)

        # Static slices of the packed weight slab: [3F, F] = [W1; W2; Wmu].
        w1 = w_ref[0 * F:1 * F, :]
        w2 = w_ref[1 * F:2 * F, :]
        wmu = w_ref[2 * F:3 * F, :]

        # Packed vector slab rows: b1, g1, be1, b2, g2, be2, b_mu, <pad>.
        b1 = v_ref[0:1, :]
        g1 = v_ref[1:2, :]
        be1 = v_ref[2:3, :]
        b2 = v_ref[3:4, :]
        g2 = v_ref[4:5, :]
        be2 = v_ref[5:6, :]
        bmu = v_ref[6:7, :]

        # Lane mask for the true hidden width (padded lanes must not shift LN stats).
        lane = jax.lax.broadcasted_iota(jnp.int32, (1, F), 1)
        hmask = (lane < hidden).astype(jnp.float32)

        def layernorm(h, g, b):
            # Padded lanes of h are exactly 0, so a full-lane sum / true-H == mean.
            mean = jnp.sum(h, axis=-1, keepdims=True) * inv_h
            centered = (h - mean) * hmask            # zero the padded lanes
            var = jnp.sum(centered * centered, axis=-1, keepdims=True) * inv_h
            inv = jax.lax.rsqrt(var + LN_EPS)
            return centered * inv * g + b            # padded lanes: 0*g + 0 = 0

        # linear1 -> ln1 -> relu
        h = jnp.dot(x, w1, preferred_element_type=jnp.float32) + b1
        h = jnp.maximum(layernorm(h, g1, be1), 0.0)

        # linear2 -> ln2 -> relu
        h = jnp.dot(h, w2, preferred_element_type=jnp.float32) + b2
        h = jnp.maximum(layernorm(h, g2, be2), 0.0)

        # mu -> tanh   (padded output lanes stay 0; sliced off in the wrapper)
        mu = jnp.dot(h, wmu, preferred_element_type=jnp.float32) + bmu
        out_ref[...] = jnp.tanh(mu).astype(out_ref.dtype)

    return kernel


def _pack_params(p, F):
    """Pack all params into one [3F,F] weight slab and one [8,F] vector slab."""
    def pad_mat(w):
        out = jnp.zeros((F, F), jnp.float32)
        return out.at[:w.shape[0], :w.shape[1]].set(w)

    def pad_vec(v):
        v = jnp.asarray(v, jnp.float32).reshape(-1)
        out = jnp.zeros((F,), jnp.float32)
        return out.at[:v.shape[0]].set(v)

    w_slab = jnp.concatenate(
        [pad_mat(p["w1"]), pad_mat(p["w2"]), pad_mat(p["w_mu"])], axis=0)
    v_rows = [p["b1"], p["g1"], p["be1"], p["b2"], p["g2"], p["be2"], p["b_mu"],
              jnp.zeros((F,), jnp.float32)]
    v_slab = jnp.stack([pad_vec(r) for r in v_rows], axis=0)   # [8, F]
    return w_slab, v_slab


def actor_forward(x, params, *, batch_tile=None):
    """x: [B, num_inputs] f32. params: dict from init_actor_params (unpadded)."""
    B, num_inputs = x.shape
    hidden = params["w1"].shape[1]
    num_outputs = params["w_mu"].shape[1]

    # Common lane-dense padded feature width.
    F = max(_round_up(num_inputs, LANE),
            _round_up(hidden, LANE),
            _round_up(num_outputs, LANE))

    # Batch tile: large tiles for realistic RL batches, minimal padding otherwise.
    if batch_tile is None:
        batch_tile = 512 if B >= 512 else _round_up(B, 8)
    b_pad = _round_up(B, batch_tile)

    x_p = jnp.zeros((b_pad, F), jnp.float32).at[:B, :num_inputs].set(x)
    w_slab, v_slab = _pack_params(params, F)

    kernel = _make_actor_kernel(F, hidden)

    flops = 2 * B * (num_inputs * hidden + hidden * hidden + hidden * num_outputs)
    bytes_accessed = 4 * (x_p.size + w_slab.size + v_slab.size + b_pad * F)
    transcendentals = B * (num_outputs + 2)   # tanh lanes + 2 rsqrt per row

    out = pl.pallas_call(
        kernel,
        out_shape=jax.ShapeDtypeStruct((b_pad, F), jnp.float32),
        grid_spec=pltpu.PrefetchScalarGridSpec(
            num_scalar_prefetch=0,
            grid=(b_pad // batch_tile,),
            in_specs=[
                pl.BlockSpec((batch_tile, F), lambda i: (i, 0)),   # activations
                pl.BlockSpec((3 * F, F), lambda i: (0, 0)),        # weight slab (resident)
                pl.BlockSpec((8, F), lambda i: (0, 0)),            # vector slab (resident)
            ],
            out_specs=pl.BlockSpec((batch_tile, F), lambda i: (i, 0)),
        ),
        compiler_params=pltpu.CompilerParams(
            dimension_semantics=("parallel",)),
        cost_estimate=pl.CostEstimate(
            flops=flops,
            transcendentals=transcendentals,
            bytes_accessed=bytes_accessed),
    )(x_p, w_slab, v_slab)

    return out[:B, :num_outputs]


def init_actor_params(key, num_inputs, hidden_size, num_outputs):
    """Synthetic init mirroring nn.Linear / nn.LayerNorm.

    Linear weights stored transposed: [in_features, out_features];
    biases / LN params stored as [1, feature].
    """
    ks = jax.random.split(key, 6)

    def linear(kw, kb, fan_in, fan_out):
        bound = 1.0 / jnp.sqrt(fan_in)
        w = jax.random.uniform(kw, (fan_in, fan_out), jnp.float32, -bound, bound)
        b = jax.random.uniform(kb, (1, fan_out), jnp.float32, -bound, bound)
        return w, b

    w1, b1 = linear(ks[0], ks[1], num_inputs, hidden_size)
    w2, b2 = linear(ks[2], ks[3], hidden_size, hidden_size)
    w_mu, b_mu = linear(ks[4], ks[5], hidden_size, num_outputs)
    # self.mu.weight.data.mul_(0.1); self.mu.bias.data.mul_(0.1)
    w_mu = w_mu * 0.1
    b_mu = b_mu * 0.1

    return {
        "w1": w1, "b1": b1,
        "g1": jnp.ones((1, hidden_size), jnp.float32),
        "be1": jnp.zeros((1, hidden_size), jnp.float32),
        "w2": w2, "b2": b2,
        "g2": jnp.ones((1, hidden_size), jnp.float32),
        "be2": jnp.zeros((1, hidden_size), jnp.float32),
        "w_mu": w_mu, "b_mu": b_mu,
    }


def actor_reference(x, p):
    """Pure-JAX reference for correctness check (unpadded math)."""
    def ln(h, g, b):
        m = h.mean(-1, keepdims=True)
        v = ((h - m) ** 2).mean(-1, keepdims=True)
        return (h - m) / jnp.sqrt(v + LN_EPS) * g + b

    h = jax.nn.relu(ln(x @ p["w1"] + p["b1"], p["g1"], p["be1"]))
    h = jax.nn.relu(ln(h @ p["w2"] + p["b2"], p["g2"], p["be2"]))
    return jnp.tanh(h @ p["w_mu"] + p["b_mu"])


if __name__ == "__main__":
    batch = 8
    num_inputs = 16      # observation dim
    hidden_size = 32
    num_outputs = 4      # action_space.shape[0]

    key = jax.random.PRNGKey(0)
    k_x, k_p = jax.random.split(key)

    x = jax.random.normal(k_x, (batch, num_inputs), jnp.float32)
    params = init_actor_params(k_p, num_inputs, hidden_size, num_outputs)

    out = actor_forward(x, params)
    out = jax.block_until_ready(out)

    ref = actor_reference(x, params)
    assert out.shape == (batch, num_outputs)
    assert jnp.allclose(out, ref, atol=1e-5, rtol=1e-5)

    print("KERNEL_OK")
</pallas_src>

<mosaic_0001>
module attributes {stable_mosaic.version = 11 : i64} {
  func.func @kernel(%arg0: i32, %arg1: memref<8x128xf32, #tpu.memory_space<vmem>>, %arg2: memref<384x128xf32, #tpu.memory_space<vmem>>, %arg3: memref<8x128xf32, #tpu.memory_space<vmem>>, %arg4: memref<8x128xf32, #tpu.memory_space<vmem>>) attributes {dimension_semantics = [#tpu.dimension_semantics<parallel>], iteration_bounds = array<i64: 1>, scalar_prefetch = 0 : i64, scratch_operands = 0 : i64, tpu.core_type = #tpu.core_type<tc>, window_params = [{transform_indices = @transform_0, window_bounds = array<i64: 8, 128>}, {pipeline_mode = #tpu.pipeline_mode<synchronous>, transform_indices = @transform_1, window_bounds = array<i64: 384, 128>}, {pipeline_mode = #tpu.pipeline_mode<synchronous>, transform_indices = @transform_2, window_bounds = array<i64: 8, 128>}, {transform_indices = @transform_3, window_bounds = array<i64: 8, 128>}]} {
    %c0 = arith.constant 0 : index
    %c0_0 = arith.constant 0 : index
    %0 = vector.load %arg1[%c0, %c0_0] : memref<8x128xf32, #tpu.memory_space<vmem>>, vector<8x128xf32>
    %c0_1 = arith.constant 0 : index
    %c0_2 = arith.constant 0 : index
    %1 = vector.load %arg2[%c0_1, %c0_2] : memref<384x128xf32, #tpu.memory_space<vmem>>, vector<128x128xf32>
    %c128 = arith.constant 128 : index
    %c0_3 = arith.constant 0 : index
    %2 = vector.load %arg2[%c128, %c0_3] : memref<384x128xf32, #tpu.memory_space<vmem>>, vector<128x128xf32>
    %c256 = arith.constant 256 : index
    %c0_4 = arith.constant 0 : index
    %3 = vector.load %arg2[%c256, %c0_4] : memref<384x128xf32, #tpu.memory_space<vmem>>, vector<128x128xf32>
    %c0_5 = arith.constant 0 : index
    %c0_6 = arith.constant 0 : index
    %4 = vector.load %arg3[%c0_5, %c0_6] : memref<8x128xf32, #tpu.memory_space<vmem>>, vector<1x128xf32>
    %c1 = arith.constant 1 : index
    %c0_7 = arith.constant 0 : index
    %5 = vector.load %arg3[%c1, %c0_7] : memref<8x128xf32, #tpu.memory_space<vmem>>, vector<1x128xf32>
    %c2 = arith.constant 2 : index
    %c0_8 = arith.constant 0 : index
    %6 = vector.load %arg3[%c2, %c0_8] : memref<8x128xf32, #tpu.memory_space<vmem>>, vector<1x128xf32>
    %c3 = arith.constant 3 : index
    %c0_9 = arith.constant 0 : index
    %7 = vector.load %arg3[%c3, %c0_9] : memref<8x128xf32, #tpu.memory_space<vmem>>, vector<1x128xf32>
    %c4 = arith.constant 4 : index
    %c0_10 = arith.constant 0 : index
    %8 = vector.load %arg3[%c4, %c0_10] : memref<8x128xf32, #tpu.memory_space<vmem>>, vector<1x128xf32>
    %c5 = arith.constant 5 : index
    %c0_11 = arith.constant 0 : index
    %9 = vector.load %arg3[%c5, %c0_11] : memref<8x128xf32, #tpu.memory_space<vmem>>, vector<1x128xf32>
    %c6 = arith.constant 6 : index
    %c0_12 = arith.constant 0 : index
    %10 = vector.load %arg3[%c6, %c0_12] : memref<8x128xf32, #tpu.memory_space<vmem>>, vector<1x128xf32>
    %11 = tpu.iota {dimensions = array<i32: 1>} : vector<1x128xi32>
    %c32_i32 = arith.constant 32 : i32
    %12 = vector.broadcast %c32_i32 : i32 to vector<1x128xi32>
    %13 = arith.cmpi slt, %11, %12 : vector<1x128xi32>
    %14 = arith.extui %13 : vector<1x128xi1> to vector<1x128xi32>
    %15 = arith.sitofp %14 : vector<1x128xi32> to vector<1x128xf32>
    %cst = arith.constant dense<0.000000e+00> : vector<8x128xf32>
    %16 = tpu.matmul %0, %1, %cst {dimension_numbers = #tpu.dot_dimension_numbers<[1], [0], [0], [1], [0, 0, 1, 1], [], []>} : vector<8x128xf32>, vector<128x128xf32>, vector<8x128xf32> -> vector<8x128xf32>
    %17 = vector.broadcast %4 : vector<1x128xf32> to vector<8x128xf32>
    %18 = arith.addf %16, %17 : vector<8x128xf32>
    %cst_13 = arith.constant dense<0.000000e+00> : vector<8xf32>
    %19 = vector.multi_reduction <add>, %18, %cst_13 [1] : vector<8x128xf32> to vector<8xf32>
    %20 = vector.shape_cast %19 : vector<8xf32> to vector<8x1xf32>
    %cst_14 = arith.constant 3.125000e-02 : f32
    %21 = vector.broadcast %cst_14 : f32 to vector<8x1xf32>
    %22 = arith.mulf %20, %21 : vector<8x1xf32>
    %23 = vector.broadcast %22 : vector<8x1xf32> to vector<8x128xf32>
    %24 = arith.subf %18, %23 : vector<8x128xf32>
    %25 = vector.broadcast %15 : vector<1x128xf32> to vector<8x128xf32>
    %26 = arith.mulf %24, %25 : vector<8x128xf32>
    %27 = arith.mulf %26, %26 : vector<8x128xf32>
    %cst_15 = arith.constant dense<0.000000e+00> : vector<8xf32>
    %28 = vector.multi_reduction <add>, %27, %cst_15 [1] : vector<8x128xf32> to vector<8xf32>
    %29 = vector.shape_cast %28 : vector<8xf32> to vector<8x1xf32>
    %cst_16 = arith.constant 3.125000e-02 : f32
    %30 = vector.broadcast %cst_16 : f32 to vector<8x1xf32>
    %31 = arith.mulf %29, %30 : vector<8x1xf32>
    %cst_17 = arith.constant 9.99999974E-6 : f32
    %32 = vector.broadcast %cst_17 : f32 to vector<8x1xf32>
    %33 = arith.addf %31, %32 : vector<8x1xf32>
    %34 = math.rsqrt %33 : vector<8x1xf32>
    %35 = vector.broadcast %34 : vector<8x1xf32> to vector<8x128xf32>
    %36 = arith.mulf %26, %35 : vector<8x128xf32>
    %37 = vector.broadcast %5 : vector<1x128xf32> to vector<8x128xf32>
    %38 = arith.mulf %36, %37 : vector<8x128xf32>
    %39 = vector.broadcast %6 : vector<1x128xf32> to vector<8x128xf32>
    %40 = arith.addf %38, %39 : vector<8x128xf32>
    %cst_18 = arith.constant 0.000000e+00 : f32
    %41 = vector.broadcast %cst_18 : f32 to vector<8x128xf32>
    %42 = arith.maximumf %40, %41 : vector<8x128xf32>
    %cst_19 = arith.constant dense<0.000000e+00> : vector<8x128xf32>
    %43 = tpu.matmul %42, %2, %cst_19 {dimension_numbers = #tpu.dot_dimension_numbers<[1], [0], [0], [1], [0, 0, 1, 1], [], []>} : vector<8x128xf32>, vector<128x128xf32>, vector<8x128xf32> -> vector<8x128xf32>
    %44 = vector.broadcast %7 : vector<1x128xf32> to vector<8x128xf32>
    %45 = arith.addf %43, %44 : vector<8x128xf32>
    %cst_20 = arith.constant dense<0.000000e+00> : vector<8xf32>
    %46 = vector.multi_reduction <add>, %45, %cst_20 [1] : vector<8x128xf32> to vector<8xf32>
    %47 = vector.shape_cast %46 : vector<8xf32> to vector<8x1xf32>
    %cst_21 = arith.constant 3.125000e-02 : f32
    %48 = vector.broadcast %cst_21 : f32 to vector<8x1xf32>
    %49 = arith.mulf %47, %48 : vector<8x1xf32>
    %50 = vector.broadcast %49 : vector<8x1xf32> to vector<8x128xf32>
    %51 = arith.subf %45, %50 : vector<8x128xf32>
    %52 = vector.broadcast %15 : vector<1x128xf32> to vector<8x128xf32>
    %53 = arith.mulf %51, %52 : vector<8x128xf32>
    %54 = arith.mulf %53, %53 : vector<8x128xf32>
    %cst_22 = arith.constant dense<0.000000e+00> : vector<8xf32>
    %55 = vector.multi_reduction <add>, %54, %cst_22 [1] : vector<8x128xf32> to vector<8xf32>
    %56 = vector.shape_cast %55 : vector<8xf32> to vector<8x1xf32>
    %cst_23 = arith.constant 3.125000e-02 : f32
    %57 = vector.broadcast %cst_23 : f32 to vector<8x1xf32>
    %58 = arith.mulf %56, %57 : vector<8x1xf32>
    %cst_24 = arith.constant 9.99999974E-6 : f32
    %59 = vector.broadcast %cst_24 : f32 to vector<8x1xf32>
    %60 = arith.addf %58, %59 : vector<8x1xf32>
    %61 = math.rsqrt %60 : vector<8x1xf32>
    %62 = vector.broadcast %61 : vector<8x1xf32> to vector<8x128xf32>
    %63 = arith.mulf %53, %62 : vector<8x128xf32>
    %64 = vector.broadcast %8 : vector<1x128xf32> to vector<8x128xf32>
    %65 = arith.mulf %63, %64 : vector<8x128xf32>
    %66 = vector.broadcast %9 : vector<1x128xf32> to vector<8x128xf32>
    %67 = arith.addf %65, %66 : vector<8x128xf32>
    %cst_25 = arith.constant 0.000000e+00 : f32
    %68 = vector.broadcast %cst_25 : f32 to vector<8x128xf32>
    %69 = arith.maximumf %67, %68 : vector<8x128xf32>
    %cst_26 = arith.constant dense<0.000000e+00> : vector<8x128xf32>
    %70 = tpu.matmul %69, %3, %cst_26 {dimension_numbers = #tpu.dot_dimension_numbers<[1], [0], [0], [1], [0, 0, 1, 1], [], []>} : vector<8x128xf32>, vector<128x128xf32>, vector<8x128xf32> -> vector<8x128xf32>
    %71 = vector.broadcast %10 : vector<1x128xf32> to vector<8x128xf32>
    %72 = arith.addf %70, %71 : vector<8x128xf32>
    %73 = math.tanh %72 : vector<8x128xf32>
    %c0_27 = arith.constant 0 : index
    %c0_28 = arith.constant 0 : index
    %74 = vector.load %arg4[%c0_27, %c0_28] : memref<8x128xf32, #tpu.memory_space<vmem>>, vector<8x128xf32>
    tpu.vector_store %arg4[%c0_27, %c0_28], %73 {strides = array<i32>} : memref<8x128xf32, #tpu.memory_space<vmem>>, vector<8x128xf32>,
    return
  }
  func.func @transform_0(%arg0: i32) -> (i32, i32) {
    %c0_i32 = arith.constant 0 : i32
    %c0_i32_0 = arith.constant 0 : i32
    return %arg0, %c0_i32 : i32, i32
  }
  func.func @transform_1(%arg0: i32) -> (i32, i32) {
    %c0_i32 = arith.constant 0 : i32
    %c0_i32_0 = arith.constant 0 : i32
    %c0_i32_1 = arith.constant 0 : i32
    return %c0_i32, %c0_i32_0 : i32, i32
  }
  func.func @transform_2(%arg0: i32) -> (i32, i32) {
    %c0_i32 = arith.constant 0 : i32
    %c0_i32_0 = arith.constant 0 : i32
    %c0_i32_1 = arith.constant 0 : i32
    return %c0_i32, %c0_i32_0 : i32, i32
  }
  func.func @transform_3(%arg0: i32) -> (i32, i32) {
    %c0_i32 = arith.constant 0 : i32
    %c0_i32_0 = arith.constant 0 : i32
    return %arg0, %c0_i32 : i32, i32
  }
}

</mosaic_0001>

<bundles_post_ra>
// kernel: tpu_custom_call.1
= control target key start
LH: loop header
LB: loop body
LE: loop exit
PB: predicated region body
PF: predicated region fallthrough
CT: control target
= control target key end

     0   :  { %8 = vsyncpa [#allocation3], 0  ;;  %s762_s0 = inlined_call_operand.hbm [shape: f32[8,128], index: 0, kind: input, shape index: {}]   ;;  %s763_s1 = inlined_call_operand.hbm [shape: f32[384,128], index: 1, kind: input, shape index: {}]   ;;  %s764_s2 = inlined_call_operand.hbm [shape: f32[8,128], index: 2, kind: input, shape index: {}]   ;;  %s765_s3 = inlined_call_operand.hbm [shape: f32[8,128], index: 3, kind: output, shape index: {}]  }
   0x1   :  { %9 = vsyncpa [#allocation6], 0 }
   0x2   :  { %10 = vsyncpa [#allocation4], 0  ;;  %s663_s12 = smov [#allocation5]  }
   0x3   :  { %s26_s13 = sshll.u32 %s663_s12, 4  ;;  %s27_s13 = int_to_ptr.vmem [resolvable:$true] %s26_s13 }
   0x4   :  { %s585_s14 = scalar_lea.vmem %s27_s13, 6144  ;;  %p590_p1 = scmp.lt.s32.totalorder %s27_s13, %s27_s13 }
   0x5   :  { %p586_p0 = scmp.ne.s32.totalorder %s27_s13, %s585_s14  ;;  %p591_p2 = scmp.lt.s32.totalorder %s585_s14, %s585_s14 }
   0x7   :  { %p592_p3 = por %p591_p2, %p590_p1 }
   0x9   :  { %p593_p4 = pnand %p592_p3, %p586_p0 }
   0xb   :  { %596 = shalt.err (!%p593_p4)
}
   0xc   :  { %s664_s15 = smov 128   ;;  %s665_s16 = smov 8  }
   0xd   :  { %32 = dma.hbm_to_vmem [thread:$0]  %s763_s1, 6144, %s27_s13, [#allocation6], %s664_s15, %s664_s15, %s665_s16  }
   0xe   :  { %s666_s19 = smov [#allocation2]   ;;  %s667_s21 = smov [#allocation7]  }
   0xf   :  { %s17_s20 = sshll.u32 %s666_s19, 4  ;;  %s39_s22 = sshll.u32 %s667_s21, 4  ;;  %s18_s20 = int_to_ptr.vmem [resolvable:$true] %s17_s20  ;;  %s40_s22 = int_to_ptr.vmem [resolvable:$true] %s39_s22 }
  0x10   :  { %s605_s23 = scalar_lea.vmem %s18_s20, 128  ;;  %p610_p6 = scmp.lt.s32.totalorder %s18_s20, %s18_s20 }
  0x11   :  { %p606_p5 = scmp.ne.s32.totalorder %s18_s20, %s605_s23  ;;  %p611_p7 = scmp.lt.s32.totalorder %s605_s23, %s605_s23 }
  0x13   :  { %p612_p8 = por %p611_p7, %p610_p6 }
  0x15   :  { %p613_p9 = pnand %p612_p8, %p606_p5 }
  0x17   :  { %616 = shalt.err (!%p613_p9)
}
  0x18   :  { %20 = dma.hbm_to_vmem [thread:$0]  %s762_s0, 128, %s18_s20, [#allocation3]  }
  0x19   :  { %s625_s26 = scalar_lea.vmem %s40_s22, 128  ;;  %p630_p11 = scmp.lt.s32.totalorder %s40_s22, %s40_s22 }
  0x1a   :  { %p626_p10 = scmp.ne.s32.totalorder %s40_s22, %s625_s26  ;;  %p631_p12 = scmp.lt.s32.totalorder %s625_s26, %s625_s26 }
  0x1c   :  { %p632_p13 = por %p631_p12, %p630_p11 }
  0x1e   :  { %p633_p0 = pnand %p632_p13, %p626_p10 }
  0x20   :  { %636 = shalt.err (!%p633_p0)
}
  0x21   :  { %42 = dma.hbm_to_vmem [thread:$0]  %s764_s2, 128, %s40_s22, [#allocation6]  }
  0x22   :  { %657 = dma.done.wait [#allocation3], 128  }
  0x23   :  { %658 = vsyncadd [#allocation3], 4294967168 }
  0x24   :  { %659 = dma.done.wait [#allocation6], 6272  }
  0x25   :  { %660 = vsyncadd [#allocation6], 4294961024  ;;  %v668_v0 = vmov 0.0   ;;  %vm669_vm0 = vmmov 0   ;;  %v68_v1 = vld [vmem:[#allocation5 + $0x78] sm:$0xff]  ;;  %v67_v2 = vld [vmem:[#allocation5 + $0x70] sm:$0xff]  ;;  %v108_v25 = vlaneseq }
  0x26   :  { %458 = vmatprep.subr.mxu0 %v668_v0  ;;  %490 = vmatprep.mubr.msk.f32.mxu0 %vm669_vm0, %v668_v0  ;;  %v66_v3 = vld [vmem:[#allocation5 + $0x68] sm:$0xff]  ;;  %v65_v4 = vld [vmem:[#allocation5 + $0x60] sm:$0xff]  ;;  %v64_v5 = vld [vmem:[#allocation5 + $0x58] sm:$0xff]  ;;  %s670_s0 = smov [#allocation8]  }
  0x27   :  { %493 = vmatprep.subr.mxu1 %v668_v0  ;;  %525 = vmatprep.mubr.msk.f32.mxu1 %vm669_vm0, %v668_v0  ;;  %v63_v6 = vld [vmem:[#allocation5 + $0x50] sm:$0xff]  ;;  %v62_v7 = vld [vmem:[#allocation5 + $0x48] sm:$0xff]  ;;  %v61_v8 = vld [vmem:[#allocation5 + $0x40] sm:$0xff]  ;;  %v109_v26 = vand.u32 127, %v108_v25  ;;  %s389_s2 = sshll.u32 %s670_s0, 4  ;;  %s390_s2 = int_to_ptr.vmem [resolvable:$true] %s389_s2 }
  0x28   :  { %459 = vmatpush3.msra.mxu0 %v68_v1  ;;  %v60_v9 = vld [vmem:[#allocation5 + $0x38] sm:$0xff]  ;;  %v59_v10 = vld [vmem:[#allocation5 + $0x30] sm:$0xff]  ;;  %v58_v11 = vld [vmem:[#allocation5 + $0x28] sm:$0xff]  ;;  %s637_s28 = scalar_lea.vmem %s390_s2, 128  ;;  %p642_p2 = scmp.lt.s32.totalorder %s390_s2, %s390_s2 }
  0x29   :  { %460 = vmatprep.subr.mxu0 %v668_v0  ;;  %v57_v12 = vld [vmem:[#allocation5 + $0x20] sm:$0xff]  ;;  %v56_v13 = vld [vmem:[#allocation5 + $0x18] sm:$0xff]  ;;  %v55_v14 = vld [vmem:[#allocation5 + $0x10] sm:$0xff]  ;;  %vm110_vm1 = vcmp.lt.s32.totalorder %v109_v26, 32  ;;  %p638_p1 = scmp.ne.s32.totalorder %s390_s2, %s637_s28  ;;  %p643_p3 = scmp.lt.s32.totalorder %s637_s28, %s637_s28 }
  0x2a   :  { %461 = vmatpush3.msra.mxu0 %v67_v2  ;;  %v54_v15 = vld [vmem:[#allocation5 + $0x8] sm:$0xff]  ;;  %v53_v16 = vld [vmem:[#allocation5] sm:$0xff]  ;;  %v52_v17 = vld [vmem:[#allocation2] sm:$0xff]  ;;  %v728_v29 = vsel %vm110_vm1, 1.0, %v668_v0 }
  0x2b   :  { %462 = vmatprep.subr.mxu0 %v668_v0  ;;  %v400_v18 = vld [vmem:[#allocation7] ss:$0 sm:$0xff]  ;;  %v84_v22 = vld [vmem:[#allocation5 + $0xf8] sm:$0xff]  ;;  %v83_v23 = vld [vmem:[#allocation5 + $0xf0] sm:$0xff]  ;;  %p644_p4 = por %p643_p3, %p642_p2 }
  0x2c   :  { %463 = vmatpush3.msra.mxu0 %v66_v3  ;;  %494 = vmatpush3.msra.mxu1 %v84_v22  ;;  %v82_v24 = vld [vmem:[#allocation5 + $0xe8] sm:$0xff]  ;;  %v81_v33 = vld [vmem:[#allocation5 + $0xe0] sm:$0xff]  ;;  %v80_v34 = vld [vmem:[#allocation5 + $0xd8] sm:$0xff] }
  0x2d   :  { %464 = vmatprep.subr.mxu0 %v668_v0  ;;  %495 = vmatprep.subr.mxu1 %v668_v0  ;;  %v79_v35 = vld [vmem:[#allocation5 + $0xd0] sm:$0xff]  ;;  %v78_v36 = vld [vmem:[#allocation5 + $0xc8] sm:$0xff]  ;;  %v77_v37 = vld [vmem:[#allocation5 + $0xc0] sm:$0xff]  ;;  %p645_p5 = pnand %p644_p4, %p638_p1 }
  0x2e   :  { %465 = vmatpush3.msra.mxu0 %v65_v4  ;;  %496 = vmatpush3.msra.mxu1 %v83_v23  ;;  %v76_v38 = vld [vmem:[#allocation5 + $0xb8] sm:$0xff]  ;;  %v75_v39 = vld [vmem:[#allocation5 + $0xb0] sm:$0xff]  ;;  %v74_v40 = vld [vmem:[#allocation5 + $0xa8] sm:$0xff] }
  0x2f   :  { %466 = vmatprep.subr.mxu0 %v668_v0  ;;  %497 = vmatprep.subr.mxu1 %v668_v0  ;;  %v73_v41 = vld [vmem:[#allocation5 + $0xa0] sm:$0xff]  ;;  %v72_v42 = vld [vmem:[#allocation5 + $0x98] sm:$0xff]  ;;  %v71_v43 = vld [vmem:[#allocation5 + $0x90] sm:$0xff] }
  0x30   :  { %467 = vmatpush3.msra.mxu0 %v64_v5  ;;  %498 = vmatpush3.msra.mxu1 %v82_v24  ;;  %v70_v44 = vld [vmem:[#allocation5 + $0x88] sm:$0xff]  ;;  %v69_v45 = vld [vmem:[#allocation5 + $0x80] sm:$0xff]  ;;  %v100_v60 = vld [vmem:[#allocation5 + $0x178] sm:$0xff] }
  0x31   :  { %468 = vmatprep.subr.mxu0 %v668_v0  ;;  %499 = vmatprep.subr.mxu1 %v668_v0  ;;  %v401_v50 = vld [vmem:[#allocation7 + $0x1] ss:$0 sm:$0xff]  ;;  %v402_v52 = vld [vmem:[#allocation7 + $0x2] ss:$0 sm:$0xff]  ;;  %v403_v56 = vld [vmem:[#allocation7 + $0x3] ss:$0 sm:$0xff] }
  0x32   :  { %469 = vmatpush3.msra.mxu0 %v63_v6  ;;  %500 = vmatpush3.msra.mxu1 %v81_v33  ;;  %v99_v61 = vld [vmem:[#allocation5 + $0x170] sm:$0xff]  ;;  %v98_v62 = vld [vmem:[#allocation5 + $0x168] sm:$0xff]  ;;  %v97_v5 = vld [vmem:[#allocation5 + $0x160] sm:$0xff] }
  0x33   :  { %470 = vmatprep.subr.mxu0 %v668_v0  ;;  %501 = vmatprep.subr.mxu1 %v668_v0  ;;  %v96_v6 = vld [vmem:[#allocation5 + $0x158] sm:$0xff]  ;;  %v404_v22 = vld [vmem:[#allocation7 + $0x4] ss:$0 sm:$0xff]  ;;  %v405_v24 = vld [vmem:[#allocation7 + $0x5] ss:$0 sm:$0xff] }
  0x34   :  { %471 = vmatpush3.msra.mxu0 %v62_v7  ;;  %502 = vmatpush3.msra.mxu1 %v80_v34  ;;  %v95_v7 = vld [vmem:[#allocation5 + $0x150] sm:$0xff] }
  0x35   :  { %472 = vmatprep.subr.mxu0 %v668_v0  ;;  %503 = vmatprep.subr.mxu1 %v668_v0 }
  0x36   :  { %473 = vmatpush3.msra.mxu0 %v61_v8  ;;  %504 = vmatpush3.msra.mxu1 %v79_v35  ;;  %v94_v8 = vld [vmem:[#allocation5 + $0x148] sm:$0xff] }
  0x37   :  { %474 = vmatprep.subr.mxu0 %v668_v0  ;;  %505 = vmatprep.subr.mxu1 %v668_v0 }
  0x38   :  { %475 = vmatpush3.msra.mxu0 %v60_v9  ;;  %506 = vmatpush3.msra.mxu1 %v78_v36  ;;  %v93_v9 = vld [vmem:[#allocation5 + $0x140] sm:$0xff] }
  0x39   :  { %476 = vmatprep.subr.mxu0 %v668_v0  ;;  %507 = vmatprep.subr.mxu1 %v668_v0 }
  0x3a   :  { %477 = vmatpush3.msra.mxu0 %v59_v10  ;;  %508 = vmatpush3.msra.mxu1 %v77_v37  ;;  %v92_v10 = vld [vmem:[#allocation5 + $0x138] sm:$0xff] }
  0x3b   :  { %478 = vmatprep.subr.mxu0 %v668_v0  ;;  %509 = vmatprep.subr.mxu1 %v668_v0 }
  0x3c   :  { %479 = vmatpush3.msra.mxu0 %v58_v11  ;;  %510 = vmatpush3.msra.mxu1 %v76_v38  ;;  %v91_v11 = vld [vmem:[#allocation5 + $0x130] sm:$0xff] }
  0x3d   :  { %480 = vmatprep.subr.mxu0 %v668_v0  ;;  %511 = vmatprep.subr.mxu1 %v668_v0 }
  0x3e   :  { %481 = vmatpush3.msra.mxu0 %v57_v12  ;;  %512 = vmatpush3.msra.mxu1 %v75_v39  ;;  %v90_v12 = vld [vmem:[#allocation5 + $0x128] sm:$0xff] }
  0x3f   :  { %482 = vmatprep.subr.mxu0 %v668_v0  ;;  %513 = vmatprep.subr.mxu1 %v668_v0 }
  0x40   :  { %483 = vmatpush3.msra.mxu0 %v56_v13  ;;  %514 = vmatpush3.msra.mxu1 %v74_v40  ;;  %v89_v13 = vld [vmem:[#allocation5 + $0x120] sm:$0xff] }
  0x41   :  { %484 = vmatprep.subr.mxu0 %v668_v0  ;;  %515 = vmatprep.subr.mxu1 %v668_v0 }
  0x42   :  { %485 = vmatpush3.msra.mxu0 %v55_v14  ;;  %516 = vmatpush3.msra.mxu1 %v73_v41  ;;  %v88_v14 = vld [vmem:[#allocation5 + $0x118] sm:$0xff] }
  0x43   :  { %486 = vmatprep.subr.mxu0 %v668_v0  ;;  %517 = vmatprep.subr.mxu1 %v668_v0 }
  0x44   :  { %487 = vmatpush3.msra.mxu0 %v54_v15  ;;  %518 = vmatpush3.msra.mxu1 %v72_v42  ;;  %v87_v15 = vld [vmem:[#allocation5 + $0x110] sm:$0xff] }
  0x45   :  { %488 = vmatprep.subr.mxu0 %v668_v0  ;;  %519 = vmatprep.subr.mxu1 %v668_v0 }
  0x46   :  { %489 = vmatpush3.msra.mxu0 %v53_v16  ;;  %520 = vmatpush3.msra.mxu1 %v71_v43  ;;  %v86_v16 = vld [vmem:[#allocation5 + $0x108] sm:$0xff] }
  0x47   :  { %491 = vmatmul.mubr.f32.vlgmr.msra.gmra.mxu0 %v52_v17  ;;  %528 = vmatprep.subr.mxu0 %v668_v0  ;;  %v85_v17 = vld [vmem:[#allocation5 + $0x100] sm:$0xff] }
  0x48   :  { %560 = vmatprep.mubr.msk.f32.mxu0 %vm669_vm0, %v668_v0  ;;  %521 = vmatprep.subr.mxu1 %v668_v0 }
  0x49   :  { %522 = vmatpush3.msra.mxu1 %v70_v44  ;;  %529 = vmatpush3.msra.mxu0 %v100_v60 }
  0x4a   :  { %523 = vmatprep.subr.mxu1 %v668_v0  ;;  %530 = vmatprep.subr.mxu0 %v668_v0 }
  0x4b   :  { %524 = vmatpush3.msra.mxu1 %v69_v45  ;;  %531 = vmatpush3.msra.mxu0 %v99_v61 }
  0x4c   :  { %532 = vmatprep.subr.mxu0 %v668_v0 }
  0x4d   :  { %533 = vmatpush3.msra.mxu0 %v98_v62 }
  0x4e   :  { %534 = vmatprep.subr.mxu0 %v668_v0 }
  0x4f   :  { %535 = vmatpush3.msra.mxu0 %v97_v5 }
  0x50   :  { %536 = vmatprep.subr.mxu0 %v668_v0 }
  0x51   :  { %537 = vmatpush3.msra.mxu0 %v96_v6 }
  0x52   :  { %538 = vmatprep.subr.mxu0 %v668_v0 }
  0x53   :  { %539 = vmatpush3.msra.mxu0 %v95_v7 }
  0x54   :  { %540 = vmatprep.subr.mxu0 %v668_v0 }
  0x55   :  { %541 = vmatpush3.msra.mxu0 %v94_v8 }
  0x56   :  { %542 = vmatprep.subr.mxu0 %v668_v0 }
  0x57   :  { %543 = vmatpush3.msra.mxu0 %v93_v9 }
  0x58   :  { %544 = vmatprep.subr.mxu0 %v668_v0 }
  0x59   :  { %545 = vmatpush3.msra.mxu0 %v92_v10 }
  0x5a   :  { %546 = vmatprep.subr.mxu0 %v668_v0 }
  0x5b   :  { %547 = vmatpush3.msra.mxu0 %v91_v11 }
  0x5c   :  { %548 = vmatprep.subr.mxu0 %v668_v0 }
  0x5d   :  { %549 = vmatpush3.msra.mxu0 %v90_v12 }
  0x5e   :  { %550 = vmatprep.subr.mxu0 %v668_v0 }
  0x5f   :  { %551 = vmatpush3.msra.mxu0 %v89_v13 }
  0x60   :  { %552 = vmatprep.subr.mxu0 %v668_v0 }
  0x61   :  { %553 = vmatpush3.msra.mxu0 %v88_v14 }
  0x62   :  { %554 = vmatprep.subr.mxu0 %v668_v0 }
  0x63   :  { %555 = vmatpush3.msra.mxu0 %v87_v15 }
  0x64   :  { %556 = vmatprep.subr.mxu0 %v668_v0 }
  0x65   :  { %557 = vmatpush3.msra.mxu0 %v86_v16 }
  0x66   :  { %558 = vmatprep.subr.mxu0 %v668_v0 }
  0x67   :  { %559 = vmatpush3.msra.mxu0 %v85_v17 }
 0x107   :  { %v183_v19 = vpop.f32.mrf.mxu0 }
 0x108   :  { %v184_v20 = vadd.f32 %v400_v18, %v183_v19 }
 0x109   :  { %v492_v21 = vpop.f32.mrf.mxu0 }
 0x10a   :  { %187 = vadd.xlane.f32.xlu0 %v184_v20 }
 0x193   :  { %v188_v27 = vpop.xlane.xlu0 %187 }
 0x194   :  { %v189_v28 = vmul.f32 0.03125, %v188_v27 }
 0x196   :  { %v190_v30 = vsub.f32 %v184_v20, %v189_v28  ;;  %v406_v28 = vld [vmem:[#allocation7 + $0x6] ss:$0 sm:$0xff] }
 0x198   :  { %v191_v31 = vmul.f32 %v728_v29, %v190_v30 }
 0x19a   :  { %v192_v32 = vmul.f32 %v191_v31, %v191_v31 }
 0x19c   :  { %193 = vadd.xlane.f32.xlu0 %v192_v32 }
 0x225   :  { %v194_v46 = vpop.xlane.xlu0 %193 }
 0x226   :  { %v195_v47 = vmul.f32 0.03125, %v194_v46 }
 0x228   :  { %v196_v48 = vadd.f32 1e-05, %v195_v47 }
 0x22a   :  { %571 = vrsqrt.f32 %v196_v48 }
 0x237   :  { %v572_v49 = vpop.eup %571 }
 0x238   :  { %v198_v51 = vmul.f32 %v572_v49, %v191_v31 }
 0x23a   :  { %v203_v53 = vmul.f32 %v401_v50, %v198_v51 }
 0x23c   :  { %v208_v54 = vadd.f32 %v402_v52, %v203_v53 }
 0x23e   :  { %v209_v55 = vmax.f32 %v208_v54, 0.0 }
 0x240   :  { %526 = vmatmul.mubr.f32.vlgmr.msra.gmra.mxu1 %v209_v55 }
 0x300   :  { %v280_v57 = vpop.f32.mrf.mxu1 }
 0x301   :  { %v281_v58 = vadd.f32 %v403_v56, %v280_v57 }
 0x302   :  { %v527_v59 = vpop.f32.mrf.mxu1 }
 0x303   :  { %284 = vadd.xlane.f32.xlu1 %v281_v58 }
 0x38c   :  { %v285_v63 = vpop.xlane.xlu1 %284 }
 0x38d   :  { %v286_v1 = vmul.f32 0.03125, %v285_v63 }
 0x38f   :  { %v287_v2 = vsub.f32 %v281_v58, %v286_v1 }
 0x391   :  { %v288_v3 = vmul.f32 %v728_v29, %v287_v2 }
 0x393   :  { %v289_v4 = vmul.f32 %v288_v3, %v288_v3 }
 0x395   :  { %290 = vadd.xlane.f32.xlu1 %v289_v4 }
 0x41e   :  { %v291_v18 = vpop.xlane.xlu1 %290 }
 0x41f   :  { %v292_v19 = vmul.f32 0.03125, %v291_v18 }
 0x421   :  { %v293_v20 = vadd.f32 1e-05, %v292_v19 }
 0x423   :  { %573 = vrsqrt.f32 %v293_v20 }
 0x430   :  { %v574_v21 = vpop.eup %573 }
 0x431   :  { %v295_v23 = vmul.f32 %v574_v21, %v288_v3 }
 0x433   :  { %v300_v25 = vmul.f32 %v404_v22, %v295_v23 }
 0x435   :  { %v305_v26 = vadd.f32 %v405_v24, %v300_v25 }
 0x437   :  { %v306_v27 = vmax.f32 %v305_v26, 0.0 }
 0x439   :  { %561 = vmatmul.mubr.f32.vlgmr.msra.gmra.mxu0 %v306_v27 }
 0x4f9   :  { %v377_v29 = vpop.f32.mrf.mxu0 }
 0x4fa   :  { %v378_v30 = vadd.f32 %v406_v28, %v377_v29 }
 0x4fb   :  { %v562_v31 = vpop.f32.mrf.mxu0 }
 0x4fc   :  { %575 = vtanh.f32 %v378_v30 }
 0x509   :  { %v576_v0 = vpop.eup %575 }
 0x50a   :  { %382 = vst [vmem:[#allocation8] sm:$0xff] %v576_v0 }
 0x50b   :  { %648 = shalt.err (!%p645_p5)
}
 0x50c   :  { %392 = dma.vmem_to_hbm [thread:$0]  %s390_s2, 128, %s765_s3, [#allocation4]  }
 0x50d   :  { %661 = dma.done.wait [#allocation4], 128  }
 0x50e   :  { %662 = vsyncadd [#allocation4], 4294967168 }
 0x50f   :  { %396 = vsyncpa [#allocation3], 1 }
 0x510   :  { %397 = vsyncpa [#allocation6], 1 }
 0x511   :  { %398 = vsyncpa [#allocation4], 1 }

</bundles_post_ra>
